<compile_context>
chip_gen: v7x
topology: tpu7x:2x2x1
jax: 0.10.0
libtpu: 0.0.40
codegen_flags: <defaults>
</compile_context>

<pallas_src>
import jax
import jax.numpy as jnp
from jax.experimental import pallas as pl
from jax.experimental.pallas import tpu as pltpu

STATE_DIM = 4     # mydqn.state_len - 1  (CartPole observation dim)
HIDDEN = 10
ACTION_DIM = 2    # mydqn.action_len

# --- flat parameter layout (f32[72] in SMEM) ---
W1_OFF = 0                                  # w1 (4, 10) row-major: k*10 + j
B1_OFF = STATE_DIM * HIDDEN                 # 40: b1 (10,)
W2_OFF = B1_OFF + HIDDEN                    # 50: w2 (10, 2) row-major: j*2 + a
B2_OFF = W2_OFF + HIDDEN * ACTION_DIM       # 70: b2 (2,)
N_PARAMS = B2_OFF + ACTION_DIM              # 72


def net_kernel(x_ref, p_ref, o_ref):
    # x_ref: (STATE_DIM, B) VMEM, batch on lanes.
    # p_ref: (N_PARAMS,)    SMEM, scalar weight/bias table.
    # o_ref: (ACTION_DIM, B) VMEM.
    x_rows = [x_ref[k:k + 1, :] for k in range(STATE_DIM)]   # each (1, B)

    # Hidden layer: h_j = tanh(b1[j] + sum_k w1[k, j] * x_k)
    # 10 independent scalar-x-vector FMA chains of depth 4 (VPU), tanh on EUP.
    h = []
    for j in range(HIDDEN):
        acc = x_rows[0] * p_ref[W1_OFF + j] + p_ref[B1_OFF + j]
        for k in range(1, STATE_DIM):
            acc = acc + x_rows[k] * p_ref[W1_OFF + k * HIDDEN + j]
        h.append(jnp.tanh(acc))                               # (1, B)

    # Output layer: out_a = b2[a] + sum_j w2[j, a] * h_j
    # Two partial accumulators per output to break the depth-10 serial chain.
    for a in range(ACTION_DIM):
        acc0 = h[0] * p_ref[W2_OFF + a] + p_ref[B2_OFF + a]
        acc1 = h[1] * p_ref[W2_OFF + ACTION_DIM + a]
        for j in range(2, HIDDEN, 2):
            acc0 = acc0 + h[j] * p_ref[W2_OFF + j * ACTION_DIM + a]
            acc1 = acc1 + h[j + 1] * p_ref[W2_OFF + (j + 1) * ACTION_DIM + a]
        o_ref[a:a + 1, :] = (acc0 + acc1).astype(o_ref.dtype)


def pack_params(w1, b1, w2, b2):
    """Flatten (4,10) w1, (10,) b1, (10,2) w2, (2,) b2 into f32[72]."""
    return jnp.concatenate([
        jnp.reshape(w1, (-1,)),
        jnp.reshape(b1, (-1,)),
        jnp.reshape(w2, (-1,)),
        jnp.reshape(b2, (-1,)),
    ]).astype(jnp.float32)


def net_forward(x, params_flat):
    """x: (B, 4) float32.  Returns action values (B, 2)."""
    batch = x.shape[0]
    x_t = jnp.transpose(x)                                    # (4, B) batch->lanes
    out_t = pl.pallas_call(
        net_kernel,
        out_shape=jax.ShapeDtypeStruct((ACTION_DIM, batch), jnp.float32),
        grid=(),
        in_specs=[
            pl.BlockSpec((STATE_DIM, batch), lambda: (0, 0)),
            pl.BlockSpec(memory_space=pltpu.MemorySpace.SMEM),
        ],
        out_specs=pl.BlockSpec((ACTION_DIM, batch), lambda: (0, 0)),
    )(x_t, params_flat)
    return jnp.transpose(out_t)                               # (B, 2)


def init_params(key):
    """Parameter init mirroring Net.__init__.

    PyTorch shapes: input.weight (10, 4), input.bias (10,),
                    out.weight (2, 10),  out.bias (2,).
    Weights stored transposed to (in, out); weights ~ N(0, 0.1) as in the
    module, biases use the PyTorch default U(-1/sqrt(fan_in), 1/sqrt(fan_in)).
    """
    k1, k2, k3, k4 = jax.random.split(key, 4)
    w1 = 0.1 * jax.random.normal(k1, (STATE_DIM, HIDDEN), dtype=jnp.float32)
    b1 = jax.random.uniform(k2, (HIDDEN,), dtype=jnp.float32,
                            minval=-1.0 / jnp.sqrt(STATE_DIM),
                            maxval=1.0 / jnp.sqrt(STATE_DIM))
    w2 = 0.1 * jax.random.normal(k3, (HIDDEN, ACTION_DIM), dtype=jnp.float32)
    b2 = jax.random.uniform(k4, (ACTION_DIM,), dtype=jnp.float32,
                            minval=-1.0 / jnp.sqrt(HIDDEN),
                            maxval=1.0 / jnp.sqrt(HIDDEN))
    return w1, b1, w2, b2


if __name__ == "__main__":
    key = jax.random.PRNGKey(0)
    kx, kp = jax.random.split(key)

    batch = 32  # mydqn.batch_size
    x = jax.random.normal(kx, (batch, STATE_DIM), dtype=jnp.float32)
    w1, b1, w2, b2 = init_params(kp)
    params_flat = pack_params(w1, b1, w2, b2)

    out = net_forward(x, params_flat)
    out = jax.block_until_ready(out)

    # Pure-JAX reference check.
    ref = jnp.tanh(x @ w1 + b1[None, :]) @ w2 + b2[None, :]
    assert out.shape == (batch, ACTION_DIM)
    assert jnp.allclose(out, ref, atol=1e-5, rtol=1e-5)

    print("KERNEL_OK")
</pallas_src>

<mosaic_0001>
module attributes {stable_mosaic.version = 11 : i64} {
  func.func @net_kernel(%arg0: memref<4x32xf32, #tpu.memory_space<vmem>>, %arg1: memref<72xf32, #tpu.memory_space<smem>>, %arg2: memref<2x32xf32, #tpu.memory_space<vmem>>) attributes {dimension_semantics = [], scalar_prefetch = 0 : i64, scratch_operands = 0 : i64, tpu.core_type = #tpu.core_type<tc>} {
    %c0 = arith.constant 0 : index
    %c0_0 = arith.constant 0 : index
    %0 = vector.load %arg0[%c0, %c0_0] : memref<4x32xf32, #tpu.memory_space<vmem>>, vector<1x32xf32>
    %c1 = arith.constant 1 : index
    %c0_1 = arith.constant 0 : index
    %1 = vector.load %arg0[%c1, %c0_1] : memref<4x32xf32, #tpu.memory_space<vmem>>, vector<1x32xf32>
    %c2 = arith.constant 2 : index
    %c0_2 = arith.constant 0 : index
    %2 = vector.load %arg0[%c2, %c0_2] : memref<4x32xf32, #tpu.memory_space<vmem>>, vector<1x32xf32>
    %c3 = arith.constant 3 : index
    %c0_3 = arith.constant 0 : index
    %3 = vector.load %arg0[%c3, %c0_3] : memref<4x32xf32, #tpu.memory_space<vmem>>, vector<1x32xf32>
    %c0_4 = arith.constant 0 : index
    %4 = memref.load %arg1[%c0_4] : memref<72xf32, #tpu.memory_space<smem>>
    %5 = vector.broadcast %4 : f32 to vector<1x32xf32>
    %6 = arith.mulf %0, %5 : vector<1x32xf32>
    %c40 = arith.constant 40 : index
    %7 = memref.load %arg1[%c40] : memref<72xf32, #tpu.memory_space<smem>>
    %8 = vector.broadcast %7 : f32 to vector<1x32xf32>
    %9 = arith.addf %6, %8 : vector<1x32xf32>
    %c10 = arith.constant 10 : index
    %10 = memref.load %arg1[%c10] : memref<72xf32, #tpu.memory_space<smem>>
    %11 = vector.broadcast %10 : f32 to vector<1x32xf32>
    %12 = arith.mulf %1, %11 : vector<1x32xf32>
    %13 = arith.addf %9, %12 : vector<1x32xf32>
    %c20 = arith.constant 20 : index
    %14 = memref.load %arg1[%c20] : memref<72xf32, #tpu.memory_space<smem>>
    %15 = vector.broadcast %14 : f32 to vector<1x32xf32>
    %16 = arith.mulf %2, %15 : vector<1x32xf32>
    %17 = arith.addf %13, %16 : vector<1x32xf32>
    %c30 = arith.constant 30 : index
    %18 = memref.load %arg1[%c30] : memref<72xf32, #tpu.memory_space<smem>>
    %19 = vector.broadcast %18 : f32 to vector<1x32xf32>
    %20 = arith.mulf %3, %19 : vector<1x32xf32>
    %21 = arith.addf %17, %20 : vector<1x32xf32>
    %22 = math.tanh %21 : vector<1x32xf32>
    %c1_5 = arith.constant 1 : index
    %23 = memref.load %arg1[%c1_5] : memref<72xf32, #tpu.memory_space<smem>>
    %24 = vector.broadcast %23 : f32 to vector<1x32xf32>
    %25 = arith.mulf %0, %24 : vector<1x32xf32>
    %c41 = arith.constant 41 : index
    %26 = memref.load %arg1[%c41] : memref<72xf32, #tpu.memory_space<smem>>
    %27 = vector.broadcast %26 : f32 to vector<1x32xf32>
    %28 = arith.addf %25, %27 : vector<1x32xf32>
    %c11 = arith.constant 11 : index
    %29 = memref.load %arg1[%c11] : memref<72xf32, #tpu.memory_space<smem>>
    %30 = vector.broadcast %29 : f32 to vector<1x32xf32>
    %31 = arith.mulf %1, %30 : vector<1x32xf32>
    %32 = arith.addf %28, %31 : vector<1x32xf32>
    %c21 = arith.constant 21 : index
    %33 = memref.load %arg1[%c21] : memref<72xf32, #tpu.memory_space<smem>>
    %34 = vector.broadcast %33 : f32 to vector<1x32xf32>
    %35 = arith.mulf %2, %34 : vector<1x32xf32>
    %36 = arith.addf %32, %35 : vector<1x32xf32>
    %c31 = arith.constant 31 : index
    %37 = memref.load %arg1[%c31] : memref<72xf32, #tpu.memory_space<smem>>
    %38 = vector.broadcast %37 : f32 to vector<1x32xf32>
    %39 = arith.mulf %3, %38 : vector<1x32xf32>
    %40 = arith.addf %36, %39 : vector<1x32xf32>
    %41 = math.tanh %40 : vector<1x32xf32>
    %c2_6 = arith.constant 2 : index
    %42 = memref.load %arg1[%c2_6] : memref<72xf32, #tpu.memory_space<smem>>
    %43 = vector.broadcast %42 : f32 to vector<1x32xf32>
    %44 = arith.mulf %0, %43 : vector<1x32xf32>
    %c42 = arith.constant 42 : index
    %45 = memref.load %arg1[%c42] : memref<72xf32, #tpu.memory_space<smem>>
    %46 = vector.broadcast %45 : f32 to vector<1x32xf32>
    %47 = arith.addf %44, %46 : vector<1x32xf32>
    %c12 = arith.constant 12 : index
    %48 = memref.load %arg1[%c12] : memref<72xf32, #tpu.memory_space<smem>>
    %49 = vector.broadcast %48 : f32 to vector<1x32xf32>
    %50 = arith.mulf %1, %49 : vector<1x32xf32>
    %51 = arith.addf %47, %50 : vector<1x32xf32>
    %c22 = arith.constant 22 : index
    %52 = memref.load %arg1[%c22] : memref<72xf32, #tpu.memory_space<smem>>
    %53 = vector.broadcast %52 : f32 to vector<1x32xf32>
    %54 = arith.mulf %2, %53 : vector<1x32xf32>
    %55 = arith.addf %51, %54 : vector<1x32xf32>
    %c32 = arith.constant 32 : index
    %56 = memref.load %arg1[%c32] : memref<72xf32, #tpu.memory_space<smem>>
    %57 = vector.broadcast %56 : f32 to vector<1x32xf32>
    %58 = arith.mulf %3, %57 : vector<1x32xf32>
    %59 = arith.addf %55, %58 : vector<1x32xf32>
    %60 = math.tanh %59 : vector<1x32xf32>
    %c3_7 = arith.constant 3 : index
    %61 = memref.load %arg1[%c3_7] : memref<72xf32, #tpu.memory_space<smem>>
    %62 = vector.broadcast %61 : f32 to vector<1x32xf32>
    %63 = arith.mulf %0, %62 : vector<1x32xf32>
    %c43 = arith.constant 43 : index
    %64 = memref.load %arg1[%c43] : memref<72xf32, #tpu.memory_space<smem>>
    %65 = vector.broadcast %64 : f32 to vector<1x32xf32>
    %66 = arith.addf %63, %65 : vector<1x32xf32>
    %c13 = arith.constant 13 : index
    %67 = memref.load %arg1[%c13] : memref<72xf32, #tpu.memory_space<smem>>
    %68 = vector.broadcast %67 : f32 to vector<1x32xf32>
    %69 = arith.mulf %1, %68 : vector<1x32xf32>
    %70 = arith.addf %66, %69 : vector<1x32xf32>
    %c23 = arith.constant 23 : index
    %71 = memref.load %arg1[%c23] : memref<72xf32, #tpu.memory_space<smem>>
    %72 = vector.broadcast %71 : f32 to vector<1x32xf32>
    %73 = arith.mulf %2, %72 : vector<1x32xf32>
    %74 = arith.addf %70, %73 : vector<1x32xf32>
    %c33 = arith.constant 33 : index
    %75 = memref.load %arg1[%c33] : memref<72xf32, #tpu.memory_space<smem>>
    %76 = vector.broadcast %75 : f32 to vector<1x32xf32>
    %77 = arith.mulf %3, %76 : vector<1x32xf32>
    %78 = arith.addf %74, %77 : vector<1x32xf32>
    %79 = math.tanh %78 : vector<1x32xf32>
    %c4 = arith.constant 4 : index
    %80 = memref.load %arg1[%c4] : memref<72xf32, #tpu.memory_space<smem>>
    %81 = vector.broadcast %80 : f32 to vector<1x32xf32>
    %82 = arith.mulf %0, %81 : vector<1x32xf32>
    %c44 = arith.constant 44 : index
    %83 = memref.load %arg1[%c44] : memref<72xf32, #tpu.memory_space<smem>>
    %84 = vector.broadcast %83 : f32 to vector<1x32xf32>
    %85 = arith.addf %82, %84 : vector<1x32xf32>
    %c14 = arith.constant 14 : index
    %86 = memref.load %arg1[%c14] : memref<72xf32, #tpu.memory_space<smem>>
    %87 = vector.broadcast %86 : f32 to vector<1x32xf32>
    %88 = arith.mulf %1, %87 : vector<1x32xf32>
    %89 = arith.addf %85, %88 : vector<1x32xf32>
    %c24 = arith.constant 24 : index
    %90 = memref.load %arg1[%c24] : memref<72xf32, #tpu.memory_space<smem>>
    %91 = vector.broadcast %90 : f32 to vector<1x32xf32>
    %92 = arith.mulf %2, %91 : vector<1x32xf32>
    %93 = arith.addf %89, %92 : vector<1x32xf32>
    %c34 = arith.constant 34 : index
    %94 = memref.load %arg1[%c34] : memref<72xf32, #tpu.memory_space<smem>>
    %95 = vector.broadcast %94 : f32 to vector<1x32xf32>
    %96 = arith.mulf %3, %95 : vector<1x32xf32>
    %97 = arith.addf %93, %96 : vector<1x32xf32>
    %98 = math.tanh %97 : vector<1x32xf32>
    %c5 = arith.constant 5 : index
    %99 = memref.load %arg1[%c5] : memref<72xf32, #tpu.memory_space<smem>>
    %100 = vector.broadcast %99 : f32 to vector<1x32xf32>
    %101 = arith.mulf %0, %100 : vector<1x32xf32>
    %c45 = arith.constant 45 : index
    %102 = memref.load %arg1[%c45] : memref<72xf32, #tpu.memory_space<smem>>
    %103 = vector.broadcast %102 : f32 to vector<1x32xf32>
    %104 = arith.addf %101, %103 : vector<1x32xf32>
    %c15 = arith.constant 15 : index
    %105 = memref.load %arg1[%c15] : memref<72xf32, #tpu.memory_space<smem>>
    %106 = vector.broadcast %105 : f32 to vector<1x32xf32>
    %107 = arith.mulf %1, %106 : vector<1x32xf32>
    %108 = arith.addf %104, %107 : vector<1x32xf32>
    %c25 = arith.constant 25 : index
    %109 = memref.load %arg1[%c25] : memref<72xf32, #tpu.memory_space<smem>>
    %110 = vector.broadcast %109 : f32 to vector<1x32xf32>
    %111 = arith.mulf %2, %110 : vector<1x32xf32>
    %112 = arith.addf %108, %111 : vector<1x32xf32>
    %c35 = arith.constant 35 : index
    %113 = memref.load %arg1[%c35] : memref<72xf32, #tpu.memory_space<smem>>
    %114 = vector.broadcast %113 : f32 to vector<1x32xf32>
    %115 = arith.mulf %3, %114 : vector<1x32xf32>
    %116 = arith.addf %112, %115 : vector<1x32xf32>
    %117 = math.tanh %116 : vector<1x32xf32>
    %c6 = arith.constant 6 : index
    %118 = memref.load %arg1[%c6] : memref<72xf32, #tpu.memory_space<smem>>
    %119 = vector.broadcast %118 : f32 to vector<1x32xf32>
    %120 = arith.mulf %0, %119 : vector<1x32xf32>
    %c46 = arith.constant 46 : index
    %121 = memref.load %arg1[%c46] : memref<72xf32, #tpu.memory_space<smem>>
    %122 = vector.broadcast %121 : f32 to vector<1x32xf32>
    %123 = arith.addf %120, %122 : vector<1x32xf32>
    %c16 = arith.constant 16 : index
    %124 = memref.load %arg1[%c16] : memref<72xf32, #tpu.memory_space<smem>>
    %125 = vector.broadcast %124 : f32 to vector<1x32xf32>
    %126 = arith.mulf %1, %125 : vector<1x32xf32>
    %127 = arith.addf %123, %126 : vector<1x32xf32>
    %c26 = arith.constant 26 : index
    %128 = memref.load %arg1[%c26] : memref<72xf32, #tpu.memory_space<smem>>
    %129 = vector.broadcast %128 : f32 to vector<1x32xf32>
    %130 = arith.mulf %2, %129 : vector<1x32xf32>
    %131 = arith.addf %127, %130 : vector<1x32xf32>
    %c36 = arith.constant 36 : index
    %132 = memref.load %arg1[%c36] : memref<72xf32, #tpu.memory_space<smem>>
    %133 = vector.broadcast %132 : f32 to vector<1x32xf32>
    %134 = arith.mulf %3, %133 : vector<1x32xf32>
    %135 = arith.addf %131, %134 : vector<1x32xf32>
    %136 = math.tanh %135 : vector<1x32xf32>
    %c7 = arith.constant 7 : index
    %137 = memref.load %arg1[%c7] : memref<72xf32, #tpu.memory_space<smem>>
    %138 = vector.broadcast %137 : f32 to vector<1x32xf32>
    %139 = arith.mulf %0, %138 : vector<1x32xf32>
    %c47 = arith.constant 47 : index
    %140 = memref.load %arg1[%c47] : memref<72xf32, #tpu.memory_space<smem>>
    %141 = vector.broadcast %140 : f32 to vector<1x32xf32>
    %142 = arith.addf %139, %141 : vector<1x32xf32>
    %c17 = arith.constant 17 : index
    %143 = memref.load %arg1[%c17] : memref<72xf32, #tpu.memory_space<smem>>
    %144 = vector.broadcast %143 : f32 to vector<1x32xf32>
    %145 = arith.mulf %1, %144 : vector<1x32xf32>
    %146 = arith.addf %142, %145 : vector<1x32xf32>
    %c27 = arith.constant 27 : index
    %147 = memref.load %arg1[%c27] : memref<72xf32, #tpu.memory_space<smem>>
    %148 = vector.broadcast %147 : f32 to vector<1x32xf32>
    %149 = arith.mulf %2, %148 : vector<1x32xf32>
    %150 = arith.addf %146, %149 : vector<1x32xf32>
    %c37 = arith.constant 37 : index
    %151 = memref.load %arg1[%c37] : memref<72xf32, #tpu.memory_space<smem>>
    %152 = vector.broadcast %151 : f32 to vector<1x32xf32>
    %153 = arith.mulf %3, %152 : vector<1x32xf32>
    %154 = arith.addf %150, %153 : vector<1x32xf32>
    %155 = math.tanh %154 : vector<1x32xf32>
    %c8 = arith.constant 8 : index
    %156 = memref.load %arg1[%c8] : memref<72xf32, #tpu.memory_space<smem>>
    %157 = vector.broadcast %156 : f32 to vector<1x32xf32>
    %158 = arith.mulf %0, %157 : vector<1x32xf32>
    %c48 = arith.constant 48 : index
    %159 = memref.load %arg1[%c48] : memref<72xf32, #tpu.memory_space<smem>>
    %160 = vector.broadcast %159 : f32 to vector<1x32xf32>
    %161 = arith.addf %158, %160 : vector<1x32xf32>
    %c18 = arith.constant 18 : index
    %162 = memref.load %arg1[%c18] : memref<72xf32, #tpu.memory_space<smem>>
    %163 = vector.broadcast %162 : f32 to vector<1x32xf32>
    %164 = arith.mulf %1, %163 : vector<1x32xf32>
    %165 = arith.addf %161, %164 : vector<1x32xf32>
    %c28 = arith.constant 28 : index
    %166 = memref.load %arg1[%c28] : memref<72xf32, #tpu.memory_space<smem>>
    %167 = vector.broadcast %166 : f32 to vector<1x32xf32>
    %168 = arith.mulf %2, %167 : vector<1x32xf32>
    %169 = arith.addf %165, %168 : vector<1x32xf32>
    %c38 = arith.constant 38 : index
    %170 = memref.load %arg1[%c38] : memref<72xf32, #tpu.memory_space<smem>>
    %171 = vector.broadcast %170 : f32 to vector<1x32xf32>
    %172 = arith.mulf %3, %171 : vector<1x32xf32>
    %173 = arith.addf %169, %172 : vector<1x32xf32>
    %174 = math.tanh %173 : vector<1x32xf32>
    %c9 = arith.constant 9 : index
    %175 = memref.load %arg1[%c9] : memref<72xf32, #tpu.memory_space<smem>>
    %176 = vector.broadcast %175 : f32 to vector<1x32xf32>
    %177 = arith.mulf %0, %176 : vector<1x32xf32>
    %c49 = arith.constant 49 : index
    %178 = memref.load %arg1[%c49] : memref<72xf32, #tpu.memory_space<smem>>
    %179 = vector.broadcast %178 : f32 to vector<1x32xf32>
    %180 = arith.addf %177, %179 : vector<1x32xf32>
    %c19 = arith.constant 19 : index
    %181 = memref.load %arg1[%c19] : memref<72xf32, #tpu.memory_space<smem>>
    %182 = vector.broadcast %181 : f32 to vector<1x32xf32>
    %183 = arith.mulf %1, %182 : vector<1x32xf32>
    %184 = arith.addf %180, %183 : vector<1x32xf32>
    %c29 = arith.constant 29 : index
    %185 = memref.load %arg1[%c29] : memref<72xf32, #tpu.memory_space<smem>>
    %186 = vector.broadcast %185 : f32 to vector<1x32xf32>
    %187 = arith.mulf %2, %186 : vector<1x32xf32>
    %188 = arith.addf %184, %187 : vector<1x32xf32>
    %c39 = arith.constant 39 : index
    %189 = memref.load %arg1[%c39] : memref<72xf32, #tpu.memory_space<smem>>
    %190 = vector.broadcast %189 : f32 to vector<1x32xf32>
    %191 = arith.mulf %3, %190 : vector<1x32xf32>
    %192 = arith.addf %188, %191 : vector<1x32xf32>
    %193 = math.tanh %192 : vector<1x32xf32>
    %c50 = arith.constant 50 : index
    %194 = memref.load %arg1[%c50] : memref<72xf32, #tpu.memory_space<smem>>
    %195 = vector.broadcast %194 : f32 to vector<1x32xf32>
    %196 = arith.mulf %22, %195 : vector<1x32xf32>
    %c70 = arith.constant 70 : index
    %197 = memref.load %arg1[%c70] : memref<72xf32, #tpu.memory_space<smem>>
    %198 = vector.broadcast %197 : f32 to vector<1x32xf32>
    %199 = arith.addf %196, %198 : vector<1x32xf32>
    %c52 = arith.constant 52 : index
    %200 = memref.load %arg1[%c52] : memref<72xf32, #tpu.memory_space<smem>>
    %201 = vector.broadcast %200 : f32 to vector<1x32xf32>
    %202 = arith.mulf %41, %201 : vector<1x32xf32>
    %c54 = arith.constant 54 : index
    %203 = memref.load %arg1[%c54] : memref<72xf32, #tpu.memory_space<smem>>
    %204 = vector.broadcast %203 : f32 to vector<1x32xf32>
    %205 = arith.mulf %60, %204 : vector<1x32xf32>
    %206 = arith.addf %199, %205 : vector<1x32xf32>
    %c56 = arith.constant 56 : index
    %207 = memref.load %arg1[%c56] : memref<72xf32, #tpu.memory_space<smem>>
    %208 = vector.broadcast %207 : f32 to vector<1x32xf32>
    %209 = arith.mulf %79, %208 : vector<1x32xf32>
    %210 = arith.addf %202, %209 : vector<1x32xf32>
    %c58 = arith.constant 58 : index
    %211 = memref.load %arg1[%c58] : memref<72xf32, #tpu.memory_space<smem>>
    %212 = vector.broadcast %211 : f32 to vector<1x32xf32>
    %213 = arith.mulf %98, %212 : vector<1x32xf32>
    %214 = arith.addf %206, %213 : vector<1x32xf32>
    %c60 = arith.constant 60 : index
    %215 = memref.load %arg1[%c60] : memref<72xf32, #tpu.memory_space<smem>>
    %216 = vector.broadcast %215 : f32 to vector<1x32xf32>
    %217 = arith.mulf %117, %216 : vector<1x32xf32>
    %218 = arith.addf %210, %217 : vector<1x32xf32>
    %c62 = arith.constant 62 : index
    %219 = memref.load %arg1[%c62] : memref<72xf32, #tpu.memory_space<smem>>
    %220 = vector.broadcast %219 : f32 to vector<1x32xf32>
    %221 = arith.mulf %136, %220 : vector<1x32xf32>
    %222 = arith.addf %214, %221 : vector<1x32xf32>
    %c64 = arith.constant 64 : index
    %223 = memref.load %arg1[%c64] : memref<72xf32, #tpu.memory_space<smem>>
    %224 = vector.broadcast %223 : f32 to vector<1x32xf32>
    %225 = arith.mulf %155, %224 : vector<1x32xf32>
    %226 = arith.addf %218, %225 : vector<1x32xf32>
    %c66 = arith.constant 66 : index
    %227 = memref.load %arg1[%c66] : memref<72xf32, #tpu.memory_space<smem>>
    %228 = vector.broadcast %227 : f32 to vector<1x32xf32>
    %229 = arith.mulf %174, %228 : vector<1x32xf32>
    %230 = arith.addf %222, %229 : vector<1x32xf32>
    %c68 = arith.constant 68 : index
    %231 = memref.load %arg1[%c68] : memref<72xf32, #tpu.memory_space<smem>>
    %232 = vector.broadcast %231 : f32 to vector<1x32xf32>
    %233 = arith.mulf %193, %232 : vector<1x32xf32>
    %234 = arith.addf %226, %233 : vector<1x32xf32>
    %235 = arith.addf %230, %234 : vector<1x32xf32>
    %c0_8 = arith.constant 0 : index
    %c0_9 = arith.constant 0 : index
    %236 = vector.load %arg2[%c0_8, %c0_9] : memref<2x32xf32, #tpu.memory_space<vmem>>, vector<1x32xf32>
    tpu.vector_store %arg2[%c0_8, %c0_9], %235 {strides = array<i32>} : memref<2x32xf32, #tpu.memory_space<vmem>>, vector<1x32xf32>,
    %c51 = arith.constant 51 : index
    %237 = memref.load %arg1[%c51] : memref<72xf32, #tpu.memory_space<smem>>
    %238 = vector.broadcast %237 : f32 to vector<1x32xf32>
    %239 = arith.mulf %22, %238 : vector<1x32xf32>
    %c71 = arith.constant 71 : index
    %240 = memref.load %arg1[%c71] : memref<72xf32, #tpu.memory_space<smem>>
    %241 = vector.broadcast %240 : f32 to vector<1x32xf32>
    %242 = arith.addf %239, %241 : vector<1x32xf32>
    %c53 = arith.constant 53 : index
    %243 = memref.load %arg1[%c53] : memref<72xf32, #tpu.memory_space<smem>>
    %244 = vector.broadcast %243 : f32 to vector<1x32xf32>
    %245 = arith.mulf %41, %244 : vector<1x32xf32>
    %c55 = arith.constant 55 : index
    %246 = memref.load %arg1[%c55] : memref<72xf32, #tpu.memory_space<smem>>
    %247 = vector.broadcast %246 : f32 to vector<1x32xf32>
    %248 = arith.mulf %60, %247 : vector<1x32xf32>
    %249 = arith.addf %242, %248 : vector<1x32xf32>
    %c57 = arith.constant 57 : index
    %250 = memref.load %arg1[%c57] : memref<72xf32, #tpu.memory_space<smem>>
    %251 = vector.broadcast %250 : f32 to vector<1x32xf32>
    %252 = arith.mulf %79, %251 : vector<1x32xf32>
    %253 = arith.addf %245, %252 : vector<1x32xf32>
    %c59 = arith.constant 59 : index
    %254 = memref.load %arg1[%c59] : memref<72xf32, #tpu.memory_space<smem>>
    %255 = vector.broadcast %254 : f32 to vector<1x32xf32>
    %256 = arith.mulf %98, %255 : vector<1x32xf32>
    %257 = arith.addf %249, %256 : vector<1x32xf32>
    %c61 = arith.constant 61 : index
    %258 = memref.load %arg1[%c61] : memref<72xf32, #tpu.memory_space<smem>>
    %259 = vector.broadcast %258 : f32 to vector<1x32xf32>
    %260 = arith.mulf %117, %259 : vector<1x32xf32>
    %261 = arith.addf %253, %260 : vector<1x32xf32>
    %c63 = arith.constant 63 : index
    %262 = memref.load %arg1[%c63] : memref<72xf32, #tpu.memory_space<smem>>
    %263 = vector.broadcast %262 : f32 to vector<1x32xf32>
    %264 = arith.mulf %136, %263 : vector<1x32xf32>
    %265 = arith.addf %257, %264 : vector<1x32xf32>
    %c65 = arith.constant 65 : index
    %266 = memref.load %arg1[%c65] : memref<72xf32, #tpu.memory_space<smem>>
    %267 = vector.broadcast %266 : f32 to vector<1x32xf32>
    %268 = arith.mulf %155, %267 : vector<1x32xf32>
    %269 = arith.addf %261, %268 : vector<1x32xf32>
    %c67 = arith.constant 67 : index
    %270 = memref.load %arg1[%c67] : memref<72xf32, #tpu.memory_space<smem>>
    %271 = vector.broadcast %270 : f32 to vector<1x32xf32>
    %272 = arith.mulf %174, %271 : vector<1x32xf32>
    %273 = arith.addf %265, %272 : vector<1x32xf32>
    %c69 = arith.constant 69 : index
    %274 = memref.load %arg1[%c69] : memref<72xf32, #tpu.memory_space<smem>>
    %275 = vector.broadcast %274 : f32 to vector<1x32xf32>
    %276 = arith.mulf %193, %275 : vector<1x32xf32>
    %277 = arith.addf %269, %276 : vector<1x32xf32>
    %278 = arith.addf %273, %277 : vector<1x32xf32>
    %c1_10 = arith.constant 1 : index
    %c0_11 = arith.constant 0 : index
    %279 = vector.load %arg2[%c1_10, %c0_11] : memref<2x32xf32, #tpu.memory_space<vmem>>, vector<1x32xf32>
    tpu.vector_store %arg2[%c1_10, %c0_11], %278 {strides = array<i32>} : memref<2x32xf32, #tpu.memory_space<vmem>>, vector<1x32xf32>,
    return
  }
}

</mosaic_0001>

<bundles_post_ra>
// kernel: tpu_custom_call.1
= control target key start
LH: loop header
LB: loop body
LE: loop exit
PB: predicated region body
PF: predicated region fallthrough
CT: control target
= control target key end

     0   :  { %7 = vsyncpa [#allocation3], 0  ;;  %s804_s0 = inlined_call_operand.hbm [shape: f32[4,32], index: 0, kind: input, shape index: {}]   ;;  %s805_s1 = inlined_call_operand.vmem [shape: f32[72], index: 1, kind: input, shape index: {}]   ;;  %s806_s2 = inlined_call_operand.hbm [shape: f32[2,32], index: 2, kind: output, shape index: {}]  }
   0x1   :  { %8 = vsyncpa [#allocation5], 0 }
   0x2   :  { %9 = vsyncpa [#allocation4], 0  ;;  %s26_s11 = sshll.u32 %s805_s1, 4  ;;  %s490_s12 = smov [#allocation2]   ;;  %s27_s11 = int_to_ptr.vmem [resolvable:$true] %s26_s11 }
   0x3   :  { %s16_s13 = sshll.u32 %s490_s12, 4  ;;  %s428_s16 = scalar_lea.hbm %s804_s0, 64  ;;  %s17_s13 = int_to_ptr.vmem [resolvable:$true] %s16_s13 }
   0x4   :  { %p429_p0 = scmp.ne.s32.totalorder %s804_s0, %s428_s16  ;;  %p432_p1 = scmp.lt.u32.totalorder %s428_s16, %s804_s0 }
   0x6   :  { %p434_p2 = pnand %p432_p1, %p429_p0 }
   0x8   :  { %437 = shalt.err (!%p434_p2)
}
   0x9   :  { %s438_s21 = scalar_lea.vmem %s17_s13, 64  ;;  %p443_p4 = scmp.lt.s32.totalorder %s17_s13, %s17_s13 }
   0xa   :  { %p439_p3 = scmp.ne.s32.totalorder %s17_s13, %s438_s21  ;;  %p444_p5 = scmp.lt.s32.totalorder %s438_s21, %s438_s21 }
   0xc   :  { %p445_p6 = por %p444_p5, %p443_p4 }
   0xe   :  { %p446_p7 = pnand %p445_p6, %p439_p3 }
  0x10   :  { %449 = shalt.err (!%p446_p7)
}
  0x11   :  { %19 = dma.hbm_to_vmem [thread:$0]  %s804_s0, 64, %s17_s13, [#allocation3]  }
  0x12   :  { %s450_s23 = scalar_lea.vmem %s27_s11, 16  ;;  %p455_p9 = scmp.lt.s32.totalorder %s27_s11, %s27_s11 }
  0x13   :  { %p451_p8 = scmp.ne.s32.totalorder %s27_s11, %s450_s23  ;;  %p456_p10 = scmp.lt.s32.totalorder %s450_s23, %s450_s23 }
  0x15   :  { %p457_p11 = por %p456_p10, %p455_p9 }
  0x17   :  { %p458_p12 = pnand %p457_p11, %p451_p8 }
  0x19   :  { %461 = shalt.err (!%p458_p12)
}
  0x1a   :  { %s491_s24 = smov [#allocation6]  }
  0x1b   :  { %29 = dma.vmem_to_smem %s27_s11, 16, %s491_s24, [#allocation5]  }
  0x1c   :  { %484 = dma.done.wait [#allocation3], 64  }
  0x1d   :  { %485 = vsyncadd [#allocation3], 4294967232 }
  0x1e   :  { %486 = dma.done.wait [#allocation5], 16  }
  0x1f   :  { %487 = vsyncadd [#allocation5], 4294967280 }
  0x20   :  { %36 = sfence }
  0x21   :  { %s41_s25 = sld [smem:[#allocation6]]  ;;  %s335_s27 = sld [smem:[#allocation6 + $0xa]]  ;;  %v529_v0 = vld [vmem:[#allocation2] sm:$0x1]  ;;  %v535_v1 = vld [vmem:[#allocation2 + $0x1] sm:$0x1] }
  0x22   :  { %s334_s26 = sld [smem:[#allocation6 + $0x28]]  ;;  %s336_s28 = sld [smem:[#allocation6 + $0x14]]  ;;  %v541_v2 = vld [vmem:[#allocation2 + $0x2] sm:$0x1]  ;;  %v547_v5 = vld [vmem:[#allocation2 + $0x3] sm:$0x1] }
  0x23   :  { %s523_s29 = sld [smem:[#allocation6 + $0x1e]]  ;;  %s338_s0 = sld [smem:[#allocation6 + $0x1]]  ;;  %vm273_vm0 = vcmask 253952  }
  0x24   :  { %s525_s30 = sld [smem:[#allocation6 + $0x29]]  ;;  %s527_s3 = sld [smem:[#allocation6 + $0xb]] }
  0x25   :  { %s531_s4 = sld [smem:[#allocation6 + $0x15]]  ;;  %s533_s5 = sld [smem:[#allocation6 + $0x1f]] }
  0x26   :  { %s537_s6 = sld [smem:[#allocation6 + $0x2]]  ;;  %s543_s8 = sld [smem:[#allocation6 + $0xc]] }
  0x27   :  { %s539_s7 = sld [smem:[#allocation6 + $0x2a]]  ;;  %v42_v3 = vstv %s41_s25  ;;  %s545_s9 = sld [smem:[#allocation6 + $0x16]]  ;;  %v48_v7 = vstv %s335_s27 }
  0x28   :  { %v45_v4 = vstv %s334_s26  ;;  %v43_v6 = vmul.f32 %v42_v3, %v529_v0  ;;  %v52_v8 = vstv %s336_s28  ;;  %s550_s10 = sld [smem:[#allocation6 + $0x20]]  ;;  %s552_s11 = sld [smem:[#allocation6 + $0x3]]  ;;  %v49_v9 = vmul.f32 %v48_v7, %v535_v1 }
  0x29   :  { %v56_v10 = vstv %s523_s29  ;;  %v61_v11 = vstv %s338_s0  ;;  %s556_s12 = sld [smem:[#allocation6 + $0x2b]]  ;;  %s558_s13 = sld [smem:[#allocation6 + $0xd]]  ;;  %v53_v13 = vmul.f32 %v52_v8, %v541_v2 }
  0x2a   :  { %v46_v12 = vadd.f32 %v45_v4, %v43_v6  ;;  %v62_v14 = vmul.f32 %v61_v11, %v529_v0  ;;  %v64_v15 = vstv %s525_s30  ;;  %s563_s14 = sld [smem:[#allocation6 + $0x17]]  ;;  %v57_v16 = vmul.f32 %v56_v10, %v547_v5  ;;  %s569_s15 = sld [smem:[#allocation6 + $0x21]] }
  0x2b   :  { %v67_v17 = vstv %s527_s3  ;;  %v71_v18 = vstv %s531_s4  ;;  %v75_v19 = vstv %s533_s5  ;;  %s571_s16 = sld [smem:[#allocation6 + $0x4]]  ;;  %s581_s18 = sld [smem:[#allocation6 + $0xe]] }
  0x2c   :  { %v50_v20 = vadd.f32 %v49_v9, %v46_v12  ;;  %v65_v21 = vadd.f32 %v64_v15, %v62_v14  ;;  %v68_v22 = vmul.f32 %v67_v17, %v535_v1  ;;  %v72_v23 = vmul.f32 %v71_v18, %v541_v2  ;;  %s575_s17 = sld [smem:[#allocation6 + $0x2c]]  ;;  %s583_s19 = sld [smem:[#allocation6 + $0x18]] }
  0x2d   :  { %v76_v24 = vmul.f32 %v75_v19, %v547_v5  ;;  %v80_v25 = vstv %s537_s6  ;;  %v83_v26 = vstv %s539_s7  ;;  %v86_v27 = vstv %s543_s8  ;;  %s587_s20 = sld [smem:[#allocation6 + $0x22]]  ;;  %s593_s21 = sld [smem:[#allocation6 + $0x5]] }
  0x2e   :  { %v54_v28 = vadd.f32 %v53_v13, %v50_v20  ;;  %v69_v29 = vadd.f32 %v68_v22, %v65_v21  ;;  %v81_v30 = vmul.f32 %v80_v25, %v529_v0  ;;  %v87_v31 = vmul.f32 %v86_v27, %v535_v1  ;;  %s595_s1 = sld [smem:[#allocation6 + $0x2d]]  ;;  %s598_s22 = sld [smem:[#allocation6 + $0xf]] }
  0x2f   :  { %v90_v32 = vstv %s545_s9  ;;  %v94_v33 = vstv %s550_s10  ;;  %v99_v34 = vstv %s552_s11  ;;  %v102_v35 = vstv %s556_s12  ;;  %s604_s23 = sld [smem:[#allocation6 + $0x19]]  ;;  %s606_s24 = sld [smem:[#allocation6 + $0x23]] }
  0x30   :  { %v58_v36 = vadd.f32 %v57_v16, %v54_v28  ;;  %v73_v37 = vadd.f32 %v72_v23, %v69_v29  ;;  %v84_v38 = vadd.f32 %v83_v26, %v81_v30  ;;  %v91_v39 = vmul.f32 %v90_v32, %v541_v2  ;;  %s612_s25 = sld [smem:[#allocation6 + $0x6]]  ;;  %s618_s27 = sld [smem:[#allocation6 + $0x10]] }
  0x31   :  { %v95_v40 = vmul.f32 %v94_v33, %v547_v5  ;;  %v100_v41 = vmul.f32 %v99_v34, %v529_v0  ;;  %v105_v42 = vstv %s558_s13  ;;  %v109_v43 = vstv %s563_s14  ;;  %s614_s26 = sld [smem:[#allocation6 + $0x2e]]  ;;  %s620_s28 = sld [smem:[#allocation6 + $0x1a]] }
  0x32   :  { %408 = vtanh.f32 %v58_v36  ;;  %v77_v44 = vadd.f32 %v76_v24, %v73_v37  ;;  %v88_v45 = vadd.f32 %v87_v31, %v84_v38  ;;  %v106_v46 = vmul.f32 %v105_v42, %v535_v1  ;;  %s625_s29 = sld [smem:[#allocation6 + $0x24]]  ;;  %s627_s0 = sld [smem:[#allocation6 + $0x7]] }
  0x33   :  { %v103_v47 = vadd.f32 %v102_v35, %v100_v41  ;;  %v110_v48 = vmul.f32 %v109_v43, %v541_v2  ;;  %v113_v49 = vstv %s569_s15  ;;  %v118_v50 = vstv %s571_s16  ;;  %s634_s30 = sld [smem:[#allocation6 + $0x2f]]  ;;  %s636_s3 = sld [smem:[#allocation6 + $0x11]] }
  0x34   :  { %410 = vtanh.f32 %v77_v44  ;;  %v92_v51 = vadd.f32 %v91_v39, %v88_v45  ;;  %v114_v52 = vmul.f32 %v113_v49, %v547_v5  ;;  %v119_v53 = vmul.f32 %v118_v50, %v529_v0  ;;  %s640_s4 = sld [smem:[#allocation6 + $0x1b]]  ;;  %s645_s5 = sld [smem:[#allocation6 + $0x25]] }
  0x35   :  { %v107_v54 = vadd.f32 %v106_v46, %v103_v47  ;;  %v121_v55 = vstv %s575_s17  ;;  %v124_v56 = vstv %s581_s18  ;;  %v128_v57 = vstv %s583_s19  ;;  %s647_s6 = sld [smem:[#allocation6 + $0x8]]  ;;  %s656_s8 = sld [smem:[#allocation6 + $0x12]] }
  0x36   :  { %v96_v58 = vadd.f32 %v95_v40, %v92_v51  ;;  %v122_v59 = vadd.f32 %v121_v55, %v119_v53  ;;  %v125_v60 = vmul.f32 %v124_v56, %v535_v1  ;;  %v129_v61 = vmul.f32 %v128_v57, %v541_v2  ;;  %s651_s7 = sld [smem:[#allocation6 + $0x30]]  ;;  %s658_s9 = sld [smem:[#allocation6 + $0x1c]] }
  0x37   :  { %v111_v62 = vadd.f32 %v110_v48, %v107_v54  ;;  %v132_v63 = vstv %s587_s20  ;;  %v137_v3 = vstv %s593_s21  ;;  %v140_v4 = vstv %s595_s1  ;;  %s664_s10 = sld [smem:[#allocation6 + $0x26]]  ;;  %s670_s11 = sld [smem:[#allocation6 + $0x9]] }
  0x38   :  { %412 = vtanh.f32 %v96_v58  ;;  %v126_v6 = vadd.f32 %v125_v60, %v122_v59  ;;  %v133_v7 = vmul.f32 %v132_v63, %v547_v5  ;;  %v138_v8 = vmul.f32 %v137_v3, %v529_v0  ;;  %s672_s12 = sld [smem:[#allocation6 + $0x31]]  ;;  %s677_s13 = sld [smem:[#allocation6 + $0x13]] }
  0x39   :  { %v115_v9 = vadd.f32 %v114_v52, %v111_v62  ;;  %v143_v10 = vstv %s598_s22  ;;  %v147_v11 = vstv %s604_s23  ;;  %v151_v12 = vstv %s606_s24  ;;  %s683_s14 = sld [smem:[#allocation6 + $0x1d]]  ;;  %s685_s15 = sld [smem:[#allocation6 + $0x27]] }
  0x3a   :  { %v130_v13 = vadd.f32 %v129_v61, %v126_v6  ;;  %v141_v14 = vadd.f32 %v140_v4, %v138_v8  ;;  %v144_v15 = vmul.f32 %v143_v10, %v535_v1  ;;  %v148_v16 = vmul.f32 %v147_v11, %v541_v2  ;;  %s692_s16 = sld [smem:[#allocation6 + $0x32]]  ;;  %s694_s17 = sld [smem:[#allocation6 + $0x46]] }
  0x3b   :  { %414 = vtanh.f32 %v115_v9  ;;  %v152_v17 = vmul.f32 %v151_v12, %v547_v5  ;;  %v156_v18 = vstv %s612_s25  ;;  %v159_v19 = vstv %s614_s26  ;;  %s700_s18 = sld [smem:[#allocation6 + $0x34]]  ;;  %s702_s19 = sld [smem:[#allocation6 + $0x36]] }
  0x3c   :  { %v660_v20 = vpop.eup %408  ;;  %v134_v21 = vadd.f32 %v133_v7, %v130_v13  ;;  %v145_v22 = vadd.f32 %v144_v15, %v141_v14  ;;  %v157_v23 = vmul.f32 %v156_v18, %v529_v0  ;;  %v162_v24 = vstv %s618_s27  ;;  %s707_s20 = sld [smem:[#allocation6 + $0x38]]  ;;  %s709_s21 = sld [smem:[#allocation6 + $0x3a]] }
  0x3d   :  { %v163_v25 = vmul.f32 %v162_v24, %v535_v1  ;;  %v166_v26 = vstv %s620_s28  ;;  %v170_v27 = vstv %s625_s29  ;;  %v175_v28 = vstv %s627_s0  ;;  %s718_s1 = sld [smem:[#allocation6 + $0x3c]]  ;;  %s722_s22 = sld [smem:[#allocation6 + $0x3e]] }
  0x3e   :  { %v674_v29 = vpop.eup %410  ;;  %416 = vtanh.f32 %v134_v21  ;;  %v149_v30 = vadd.f32 %v148_v16, %v145_v22  ;;  %v160_v31 = vadd.f32 %v159_v19, %v157_v23  ;;  %v167_v32 = vmul.f32 %v166_v26, %v541_v2  ;;  %s727_s23 = sld [smem:[#allocation6 + $0x40]]  ;;  %s729_s24 = sld [smem:[#allocation6 + $0x33]] }
  0x3f   :  { %v171_v33 = vmul.f32 %v170_v27, %v547_v5  ;;  %v176_v34 = vmul.f32 %v175_v28, %v529_v0  ;;  %v178_v35 = vstv %s634_s30  ;;  %v181_v36 = vstv %s636_s3  ;;  %s735_s25 = sld [smem:[#allocation6 + $0x42]]  ;;  %s737_s26 = sld [smem:[#allocation6 + $0x47]] }
  0x40   :  { %v153_v37 = vadd.f32 %v152_v17, %v149_v30  ;;  %v164_v38 = vadd.f32 %v163_v25, %v160_v31  ;;  %v182_v39 = vmul.f32 %v181_v36, %v535_v1  ;;  %v185_v40 = vstv %s640_s4  ;;  %s742_s27 = sld [smem:[#allocation6 + $0x35]]  ;;  %s744_s28 = sld [smem:[#allocation6 + $0x37]] }
  0x41   :  { %v179_v41 = vadd.f32 %v178_v35, %v176_v34  ;;  %v186_v42 = vmul.f32 %v185_v40, %v541_v2  ;;  %v189_v43 = vstv %s645_s5  ;;  %v194_v44 = vstv %s647_s6  ;;  %s748_s29 = sld [smem:[#allocation6 + $0x39]]  ;;  %s754_s0 = sld [smem:[#allocation6 + $0x3b]] }
  0x42   :  { %v696_v45 = vpop.eup %412  ;;  %418 = vtanh.f32 %v153_v37  ;;  %v168_v46 = vadd.f32 %v167_v32, %v164_v38  ;;  %v190_v47 = vmul.f32 %v189_v43, %v547_v5  ;;  %v195_v48 = vmul.f32 %v194_v44, %v529_v0  ;;  %s756_s30 = sld [smem:[#allocation6 + $0x3d]]  ;;  %s759_s3 = sld [smem:[#allocation6 + $0x3f]] }
  0x43   :  { %v183_v49 = vadd.f32 %v182_v39, %v179_v41  ;;  %v197_v50 = vstv %s651_s7  ;;  %v200_v51 = vstv %s656_s8  ;;  %v204_v52 = vstv %s658_s9  ;;  %s764_s4 = sld [smem:[#allocation6 + $0x41]]  ;;  %s766_s5 = sld [smem:[#allocation6 + $0x43]] }
  0x44   :  { %v172_v53 = vadd.f32 %v171_v33, %v168_v46  ;;  %v198_v54 = vadd.f32 %v197_v50, %v195_v48  ;;  %v201_v55 = vmul.f32 %v200_v51, %v535_v1  ;;  %v205_v56 = vmul.f32 %v204_v52, %v541_v2  ;;  %s772_s6 = sld [smem:[#allocation6 + $0x44]]  ;;  %s776_s7 = sld [smem:[#allocation6 + $0x45]] }
  0x45   :  { %v713_v57 = vpop.eup %414  ;;  %v187_v58 = vadd.f32 %v186_v42, %v183_v49  ;;  %v208_v59 = vstv %s664_s10  ;;  %v213_v60 = vstv %s670_s11  ;;  %v216_v61 = vstv %s672_s12  ;;  %s492_s8 = smov [#allocation7]  }
  0x46   :  { %420 = vtanh.f32 %v172_v53  ;;  %v202_v62 = vadd.f32 %v201_v55, %v198_v54  ;;  %v209_v63 = vmul.f32 %v208_v59, %v547_v5  ;;  %v214_v3 = vmul.f32 %v213_v60, %v529_v0  ;;  %s324_s9 = sshll.u32 %s492_s8, 4  ;;  %s325_s9 = int_to_ptr.vmem [resolvable:$true] %s324_s9 }
  0x47   :  { %v191_v4 = vadd.f32 %v190_v47, %v187_v58  ;;  %v219_v6 = vstv %s677_s13  ;;  %v223_v7 = vstv %s683_s14  ;;  %v227_v8 = vstv %s685_s15  ;;  %s462_s10 = scalar_lea.vmem %s325_s9, 32  ;;  %p467_p0 = scmp.lt.s32.totalorder %s325_s9, %s325_s9 }
  0x48   :  { %v731_v9 = vpop.eup %416  ;;  %v206_v10 = vadd.f32 %v205_v56, %v202_v62  ;;  %v217_v11 = vadd.f32 %v216_v61, %v214_v3  ;;  %v220_v12 = vmul.f32 %v219_v6, %v535_v1  ;;  %v224_v0 = vmul.f32 %v223_v7, %v541_v2  ;;  %p463_p13 = scmp.ne.s32.totalorder %s325_s9, %s462_s10  ;;  %p468_p1 = scmp.lt.s32.totalorder %s462_s10, %s462_s10 }
  0x49   :  { %422 = vtanh.f32 %v191_v4  ;;  %v228_v13 = vmul.f32 %v227_v8, %v547_v5  ;;  %v232_v14 = vstv %s692_s16  ;;  %v235_v15 = vstv %s694_s17 }
  0x4a   :  { %v210_v16 = vadd.f32 %v209_v63, %v206_v10  ;;  %v221_v1 = vadd.f32 %v220_v12, %v217_v11  ;;  %v233_v17 = vmul.f32 %v660_v20, %v232_v14  ;;  %v238_v2 = vstv %s700_s18  ;;  %p469_p2 = por %p468_p1, %p467_p0 }
  0x4b   :  { %v239_v18 = vmul.f32 %v674_v29, %v238_v2  ;;  %v241_v19 = vstv %s702_s19  ;;  %v245_v21 = vstv %s707_s20  ;;  %v249_v22 = vstv %s709_s21 }
  0x4c   :  { %v419_v5 = vpop.eup %418  ;;  %424 = vtanh.f32 %v210_v16  ;;  %v225_v23 = vadd.f32 %v224_v0, %v221_v1  ;;  %v236_v24 = vadd.f32 %v235_v15, %v233_v17  ;;  %v242_v25 = vmul.f32 %v696_v45, %v241_v19  ;;  %p470_p3 = pnand %p469_p2, %p463_p13 }
  0x4d   :  { %v246_v26 = vmul.f32 %v713_v57, %v245_v21  ;;  %v250_v27 = vmul.f32 %v731_v9, %v249_v22  ;;  %v253_v28 = vstv %s718_s1  ;;  %v257_v34 = vstv %s722_s22 }
  0x4e   :  { %v229_v30 = vadd.f32 %v228_v13, %v225_v23  ;;  %v243_v31 = vadd.f32 %v242_v25, %v236_v24  ;;  %v254_v32 = vmul.f32 %v419_v5, %v253_v28  ;;  %v261_v35 = vstv %s727_s23 }
  0x4f   :  { %v247_v33 = vadd.f32 %v246_v26, %v239_v18  ;;  %v276_v36 = vstv %s729_s24  ;;  %v265_v38 = vstv %s735_s25  ;;  %v279_v40 = vstv %s737_s26 }
  0x50   :  { %v421_v37 = vpop.eup %420  ;;  %426 = vtanh.f32 %v229_v30  ;;  %v277_v39 = vmul.f32 %v660_v20, %v276_v36  ;;  %v251_v41 = vadd.f32 %v250_v27, %v243_v31  ;;  %v282_v43 = vstv %s742_s27 }
  0x51   :  { %v255_v42 = vadd.f32 %v254_v32, %v247_v33  ;;  %v285_v44 = vstv %s744_s28  ;;  %v283_v47 = vmul.f32 %v674_v29, %v282_v43  ;;  %v289_v49 = vstv %s748_s29 }
  0x52   :  { %v280_v46 = vadd.f32 %v279_v40, %v277_v39  ;;  %v286_v48 = vmul.f32 %v696_v45, %v285_v44  ;;  %v258_v51 = vmul.f32 %v421_v37, %v257_v34  ;;  %v290_v20 = vmul.f32 %v713_v57, %v289_v49 }
  0x53   :  { %v423_v50 = vpop.eup %422  ;;  %v293_v52 = vstv %s754_s0  ;;  %v297_v53 = vstv %s756_s30  ;;  %v301_v60 = vstv %s759_s3  ;;  %v305_v61 = vstv %s764_s4 }
  0x54   :  { %v262_v54 = vmul.f32 %v423_v50, %v261_v35  ;;  %v287_v55 = vadd.f32 %v286_v48, %v280_v46  ;;  %v294_v56 = vmul.f32 %v731_v9, %v293_v52  ;;  %v298_v58 = vmul.f32 %v419_v5, %v297_v53 }
  0x55   :  { %v291_v59 = vadd.f32 %v290_v20, %v283_v47  ;;  %v309_v29 = vstv %s766_s5  ;;  %v302_v63 = vmul.f32 %v421_v37, %v301_v60  ;;  %v306_v3 = vmul.f32 %v423_v50, %v305_v61 }
  0x56   :  { %v425_v62 = vpop.eup %424  ;;  %v295_v45 = vadd.f32 %v294_v56, %v287_v55  ;;  %v259_v4 = vadd.f32 %v258_v51, %v251_v41  ;;  %v269_v8 = vstv %s772_s6  ;;  %v313_v11 = vstv %s776_s7 }
  0x57   :  { %v266_v6 = vmul.f32 %v425_v62, %v265_v38  ;;  %v299_v57 = vadd.f32 %v298_v58, %v291_v59  ;;  %v310_v7 = vmul.f32 %v425_v62, %v309_v29  ;;  %v263_v12 = vadd.f32 %v262_v54, %v255_v42 }
  0x58   :  { %v303_v10 = vadd.f32 %v302_v63, %v295_v45 }
  0x59   :  { %v307_v0 = vadd.f32 %v306_v3, %v299_v57  ;;  %v267_v13 = vadd.f32 %v266_v6, %v259_v4 }
  0x5a   :  { %v427_v9 = vpop.eup %426  ;;  %v311_v15 = vadd.f32 %v310_v7, %v303_v10 }
  0x5b   :  { %v270_v14 = vmul.f32 %v427_v9, %v269_v8  ;;  %v314_v16 = vmul.f32 %v427_v9, %v313_v11 }
  0x5d   :  { %v271_v1 = vadd.f32 %v270_v14, %v263_v12  ;;  %v315_v17 = vadd.f32 %v314_v16, %v307_v0 }
  0x5f   :  { %v272_v2 = vadd.f32 %v271_v1, %v267_v13  ;;  %v316_v18 = vadd.f32 %v315_v17, %v311_v15 }
  0x61   :  { %274 = vst.msk [vmem:[#allocation7] sm:$0x1] %vm273_vm0, %v272_v2  ;;  %317 = vst.msk [vmem:[#allocation7 + $0x1] sm:$0x1] %vm273_vm0, %v316_v18 }
  0x62   :  { %473 = shalt.err (!%p470_p3)
}
  0x63   :  { %s474_s13 = scalar_lea.hbm %s806_s2, 32 }
  0x64   :  { %p475_p4 = scmp.ne.s32.totalorder %s806_s2, %s474_s13  ;;  %p478_p5 = scmp.lt.u32.totalorder %s474_s13, %s806_s2 }
  0x66   :  { %p480_p6 = pnand %p478_p5, %p475_p4 }
  0x68   :  { %483 = shalt.err (!%p480_p6)
}
  0x69   :  { %327 = dma.vmem_to_hbm [thread:$0]  %s325_s9, 32, %s806_s2, [#allocation4]  }
  0x6a   :  { %488 = dma.done.wait [#allocation4], 32  }
  0x6b   :  { %489 = vsyncadd [#allocation4], 4294967264 }
  0x6c   :  { %331 = vsyncpa [#allocation3], 1 }
  0x6d   :  { %332 = vsyncpa [#allocation4], 1 }
  0x6e   :  { %333 = vsyncpa [#allocation5], 1 }

</bundles_post_ra>
